<compile_context>
chip_gen: v6e
topology: v6e:2x2x1
jax: 0.10.0
libtpu: 0.0.40
codegen_flags: <defaults>
</compile_context>

<pallas_src>
import functools

import jax
import jax.numpy as jnp
from jax import lax
from jax.experimental import pallas as pl
from jax.experimental.pallas import tpu as pltpu

_NEG_LARGE = -1e30  # bias fill for padded vocab columns (exp() underflows to 0)


def _round_up(x, m):
    return (x + m - 1) // m * m


# ---------------------------------------------------------------------------
# Kernel 1: one (tm rows) x (tv vocab) tile of raw logits + online LSE.
# ---------------------------------------------------------------------------
def _proj_lse_kernel(x_ref, w_ref, b_ref, logits_ref, lse_ref, m_sc, l_sc):
    j = pl.program_id(1)

    @pl.when(j == 0)
    def _():
        m_sc[...] = jnp.full_like(m_sc, -jnp.inf)
        l_sc[...] = jnp.zeros_like(l_sc)

    # (tm, K) contracted with (tv, K) over K -> (tm, tv).
    # Native-dtype operands (bf16 fast path), f32 accumulation on the MXU.
    logits = lax.dot_general(
        x_ref[...], w_ref[...],
        dimension_numbers=(((1,), (1,)), ((), ())),
        preferred_element_type=jnp.float32,
    )
    logits = logits + b_ref[...]          # bias tile is already f32

    # Stream the raw f32 logits tile out; normalization happens in kernel 2.
    logits_ref[...] = logits

    # Online max / sum-exp reduction across vocab tiles (f32 math).
    m_prev = m_sc[...]
    m_new = jnp.maximum(m_prev, jnp.max(logits, axis=-1, keepdims=True))
    l_sc[...] = (jnp.exp(m_prev - m_new) * l_sc[...]
                 + jnp.sum(jnp.exp(logits - m_new), axis=-1, keepdims=True))
    m_sc[...] = m_new

    @pl.when(j == pl.num_programs(1) - 1)
    def _():
        lse_ref[...] = m_sc[...] + jnp.log(l_sc[...])


# ---------------------------------------------------------------------------
# Kernel 2: lane-dense elementwise finalize, log_softmax = logits - lse.
# ---------------------------------------------------------------------------
def _finalize_kernel(logits_ref, lse_ref, out_ref):
    out_ref[...] = (logits_ref[...] - lse_ref[...]).astype(out_ref.dtype)


# ---------------------------------------------------------------------------
# Tile / VMEM budgeting (Python level, outside jit).
# ---------------------------------------------------------------------------
def _vmem_budget_bytes():
    cap = None
    try:
        cap = getattr(pltpu.get_tpu_info(), "vmem_capacity_bytes", None)
    except Exception:
        cap = None
    if not cap or cap <= 0:
        cap = 64 * 1024 * 1024            # conservative (v7x per-core VMEM)
    return int(cap) * 3 // 4              # headroom for compiler scratch


def _main_tile_bytes(tm, tv, d_model, xb, wb):
    """Padded per-invocation VMEM bytes of the matmul + LSE kernel."""
    kp = _round_up(d_model, 128)          # lane padding of the contraction dim
    return (2 * tm * kp * xb              # x tile, double-buffered
            + 2 * tv * kp * wb            # weight tile, double-buffered
            + 2 * 8 * tv * 4              # f32 bias tile, sublane-padded to 8
            + 2 * tm * tv * 4             # streamed f32 logits tile, 2 bufs
            + 2 * tm * 128 * 4            # lse output tile (lane-padded)
            + 2 * tm * 128 * 4            # m / l scratch (lane-padded)
            + tm * tv * 4)                # live f32 logits temporary


def _finalize_tile_bytes(tm, tv, ob):
    return 2 * tm * tv * 4 + 2 * tm * 128 * 4 + 2 * tm * tv * ob


def _select_tiles(M, vocab, d_model, xb, wb, budget):
    # tm is the intensity knob (weight HBM bytes ~ 1/tm); tv mostly amortizes
    # the ~0.35 us per-grid-step overhead.  Start big, shrink tv first.
    tm_target = 1024 if budget >= 80 * 1024 * 1024 else 512
    tm = max(8, min(tm_target, _round_up(M, 8)))
    tv = max(128, min(1024, _round_up(vocab, 128)))
    while _main_tile_bytes(tm, tv, d_model, xb, wb) > budget:
        if tv > 512:
            tv = max(512, _round_up(tv // 2, 128))
        elif tm > 256:
            tm = max(256, _round_up(tm // 2, 8))
        elif tv > 128:
            tv = max(128, _round_up(tv // 2, 128))
        elif tm > 8:
            tm = max(8, _round_up(tm // 2, 8))
        else:
            break
    return tm, tv


# ---------------------------------------------------------------------------
# Forward pass.
# ---------------------------------------------------------------------------
@functools.partial(jax.jit,
                   static_argnames=("tm", "tv", "vmem_limit", "out_dtype"))
def _forward_impl(x, weight, bias, *, tm, tv, vmem_limit, out_dtype):
    batch, seq, d_model = x.shape
    vocab = weight.shape[0]
    M = batch * seq

    M_pad = _round_up(M, tm)
    V_pad = _round_up(vocab, tv)

    x2d = x.reshape(M, d_model)
    if M_pad != M:
        x2d = jnp.pad(x2d, ((0, M_pad - M), (0, 0)))

    w = weight                             # keep nn.Linear layout (vocab, K)
    if bias is None:
        b2d = jnp.zeros((1, vocab), jnp.float32)
    else:
        b2d = bias.astype(jnp.float32).reshape(1, vocab)
    if V_pad != vocab:
        w = jnp.pad(w, ((0, V_pad - vocab), (0, 0)))
        b2d = jnp.pad(b2d, ((0, 0), (0, V_pad - vocab)),
                      constant_values=_NEG_LARGE)

    grid = (M_pad // tm, V_pad // tv)

    logits, lse = pl.pallas_call(
        _proj_lse_kernel,
        out_shape=(
            jax.ShapeDtypeStruct((M_pad, V_pad), jnp.float32),  # f32 stream
            jax.ShapeDtypeStruct((M_pad, 1), jnp.float32),      # per-row LSE
        ),
        grid_spec=pltpu.PrefetchScalarGridSpec(
            num_scalar_prefetch=0,
            grid=grid,
            in_specs=[
                pl.BlockSpec((tm, d_model), lambda i, j: (i, 0)),  # activations
                pl.BlockSpec((tv, d_model), lambda i, j: (j, 0)),  # weight
                pl.BlockSpec((1, tv), lambda i, j: (0, j)),        # bias (f32)
            ],
            out_specs=(
                pl.BlockSpec((tm, tv), lambda i, j: (i, j)),       # raw logits
                pl.BlockSpec((tm, 1), lambda i, j: (i, 0)),        # LSE
            ),
            scratch_shapes=[
                pltpu.VMEM((tm, 1), jnp.float32),   # running max
                pltpu.VMEM((tm, 1), jnp.float32),   # running sum of exp
            ],
        ),
        compiler_params=pltpu.CompilerParams(
            dimension_semantics=("parallel", "arbitrary"),
            vmem_limit_bytes=vmem_limit,
        ),
    )(x2d, w, b2d)

    # Lane-dense finalize; write in place over the f32 logit slab when the
    # requested output dtype matches.
    use_alias = jnp.dtype(out_dtype) == jnp.dtype(jnp.float32)
    logp = pl.pallas_call(
        _finalize_kernel,
        out_shape=jax.ShapeDtypeStruct((M_pad, V_pad), out_dtype),
        grid=grid,
        in_specs=[
            pl.BlockSpec((tm, tv), lambda i, j: (i, j)),
            pl.BlockSpec((tm, 1), lambda i, j: (i, 0)),
        ],
        out_specs=pl.BlockSpec((tm, tv), lambda i, j: (i, j)),
        input_output_aliases=({0: 0} if use_alias else {}),
        compiler_params=pltpu.CompilerParams(
            dimension_semantics=("parallel", "parallel"),
            vmem_limit_bytes=vmem_limit,
        ),
    )(logits, lse)

    return logp[:M, :vocab].reshape(batch, seq, vocab)


def projection_layer_forward(x, weight, bias=None, *, tm=None, tv=None,
                             out_dtype=jnp.float32):
    """x: (batch, seq, d_model); weight: (vocab, d_model); bias: (vocab,) or None."""
    batch, seq, d_model = x.shape
    vocab = weight.shape[0]
    M = batch * seq

    budget = _vmem_budget_bytes()
    xb = jnp.dtype(x.dtype).itemsize
    wb = jnp.dtype(weight.dtype).itemsize
    ob = jnp.dtype(out_dtype).itemsize

    auto_tm, auto_tv = _select_tiles(M, vocab, d_model, xb, wb, budget)
    if tm is None:
        tm = auto_tm
    else:
        tm = max(8, min(_round_up(int(tm), 8), _round_up(M, 8)))
    if tv is None:
        tv = auto_tv
    else:
        tv = max(128, min(_round_up(int(tv), 128), _round_up(vocab, 128)))

    need = max(_main_tile_bytes(tm, tv, d_model, xb, wb),
               _finalize_tile_bytes(tm, tv, ob))
    vmem_limit = int(min(max(need * 5 // 4, 32 * 1024 * 1024), budget))

    return _forward_impl(x, weight, bias, tm=int(tm), tv=int(tv),
                         vmem_limit=int(vmem_limit),
                         out_dtype=jnp.dtype(out_dtype))


if __name__ == "__main__":
    batch, seq, d_model, vocab = 2, 8, 32, 128

    key = jax.random.PRNGKey(0)
    kx, kw, kb, kw2, kb2 = jax.random.split(key, 5)

    # bf16 params/activations -> bf16 MXU fast path with f32 accumulation.
    x = jax.random.normal(kx, (batch, seq, d_model),
                          dtype=jnp.float32).astype(jnp.bfloat16)
    bound = 1.0 / (d_model ** 0.5)
    weight = jax.random.uniform(kw, (vocab, d_model), dtype=jnp.float32,
                                minval=-bound, maxval=bound).astype(jnp.bfloat16)
    bias = jax.random.uniform(kb, (vocab,), dtype=jnp.float32,
                              minval=-bound, maxval=bound).astype(jnp.bfloat16)

    def ref_fn(xx, ww, bb):
        logits = jnp.dot(xx.astype(jnp.float32), ww.astype(jnp.float32).T,
                         precision=jax.lax.Precision.HIGHEST)
        if bb is not None:
            logits = logits + bb.astype(jnp.float32)
        return jax.nn.log_softmax(logits, axis=-1)

    # Run 1: auto-selected tiles (clamped for this small problem).
    out = jax.block_until_ready(projection_layer_forward(x, weight, bias))
    assert out.shape == (batch, seq, vocab)
    assert out.dtype == jnp.float32
    assert jnp.allclose(out, ref_fn(x, weight, bias), atol=2e-3, rtol=2e-3)

    # Run 2: force the multi-tile path (row tiling + vocab tiling + padding +
    # online LSE across vocab tiles) with an awkward vocab size.
    vocab2 = 200
    weight2 = jax.random.uniform(kw2, (vocab2, d_model), dtype=jnp.float32,
                                 minval=-bound, maxval=bound).astype(jnp.bfloat16)
    bias2 = jax.random.uniform(kb2, (vocab2,), dtype=jnp.float32,
                               minval=-bound, maxval=bound).astype(jnp.bfloat16)
    out2 = jax.block_until_ready(
        projection_layer_forward(x, weight2, bias2, tm=8, tv=128))
    assert out2.shape == (batch, seq, vocab2)
    assert jnp.allclose(out2, ref_fn(x, weight2, bias2), atol=2e-3, rtol=2e-3)

    # Run 3: bias=None path (nn.Linear without bias).
    out3 = jax.block_until_ready(projection_layer_forward(x, weight, None))
    assert jnp.allclose(out3, ref_fn(x, weight, None), atol=2e-3, rtol=2e-3)

    print("KERNEL_OK")
</pallas_src>

<mosaic_0001>
module attributes {stable_mosaic.version = 11 : i64} {
  func.func @_finalize_kernel(%arg0: i32, %arg1: i32, %arg2: memref<16x128xf32, #tpu.memory_space<vmem>>, %arg3: memref<16x1xf32, #tpu.memory_space<vmem>>, %arg4: memref<16x128xf32, #tpu.memory_space<vmem>>) attributes {dimension_semantics = [#tpu.dimension_semantics<parallel>, #tpu.dimension_semantics<parallel>], iteration_bounds = array<i64: 1, 1>, scalar_prefetch = 0 : i64, scratch_operands = 0 : i64, tpu.core_type = #tpu.core_type<tc>, window_params = [{transform_indices = @transform_0, window_bounds = array<i64: 16, 128>}, {transform_indices = @transform_1, window_bounds = array<i64: 16, 1>}, {transform_indices = @transform_2, window_bounds = array<i64: 16, 128>}]} {
    %c0 = arith.constant 0 : index
    %c0_0 = arith.constant 0 : index
    %0 = vector.load %arg2[%c0, %c0_0] : memref<16x128xf32, #tpu.memory_space<vmem>>, vector<16x128xf32>
    %c0_1 = arith.constant 0 : index
    %c0_2 = arith.constant 0 : index
    %1 = vector.load %arg3[%c0_1, %c0_2] : memref<16x1xf32, #tpu.memory_space<vmem>>, vector<16x1xf32>
    %2 = vector.broadcast %1 : vector<16x1xf32> to vector<16x128xf32>
    %3 = arith.subf %0, %2 : vector<16x128xf32>
    %c0_3 = arith.constant 0 : index
    %c0_4 = arith.constant 0 : index
    %4 = vector.load %arg4[%c0_3, %c0_4] : memref<16x128xf32, #tpu.memory_space<vmem>>, vector<16x128xf32>
    tpu.vector_store %arg4[%c0_3, %c0_4], %3 {strides = array<i32>} : memref<16x128xf32, #tpu.memory_space<vmem>>, vector<16x128xf32>,
    return
  }
  func.func @transform_0(%arg0: i32, %arg1: i32) -> (i32, i32) {
    %c0_i32 = arith.constant 0 : i32
    return %arg0, %arg1 : i32, i32
  }
  func.func @transform_1(%arg0: i32, %arg1: i32) -> (i32, i32) {
    %c0_i32 = arith.constant 0 : i32
    %c0_i32_0 = arith.constant 0 : i32
    return %arg0, %c0_i32 : i32, i32
  }
  func.func @transform_2(%arg0: i32, %arg1: i32) -> (i32, i32) {
    %c0_i32 = arith.constant 0 : i32
    return %arg0, %arg1 : i32, i32
  }
}

module attributes {stable_mosaic.version = 11 : i64} {
  func.func @_proj_lse_kernel(%arg0: i32, %arg1: i32, %arg2: memref<16x32xbf16, #tpu.memory_space<vmem>>, %arg3: memref<128x32xbf16, #tpu.memory_space<vmem>>, %arg4: memref<1x128xf32, #tpu.memory_space<vmem>>, %arg5: memref<16x128xf32, #tpu.memory_space<vmem>>, %arg6: memref<16x1xf32, #tpu.memory_space<vmem>>, %arg7: memref<16x1xf32, #tpu.memory_space<vmem>>, %arg8: memref<16x1xf32, #tpu.memory_space<vmem>>) attributes {dimension_semantics = [#tpu.dimension_semantics<parallel>, #tpu.dimension_semantics<arbitrary>], iteration_bounds = array<i64: 1, 1>, scalar_prefetch = 0 : i64, scratch_operands = 2 : i64, tpu.core_type = #tpu.core_type<tc>, window_params = [{transform_indices = @transform_0, window_bounds = array<i64: 16, 32>}, {transform_indices = @transform_1, window_bounds = array<i64: 128, 32>}, {transform_indices = @transform_2, window_bounds = array<i64: 1, 128>}, {transform_indices = @transform_3, window_bounds = array<i64: 16, 128>}, {transform_indices = @transform_4, window_bounds = array<i64: 16, 1>}]} {
    %c0_i32 = arith.constant 0 : i32
    %0 = arith.cmpi eq, %arg1, %c0_i32 : i32
    %1 = arith.extui %0 : i1 to i32
    %c0_i32_0 = arith.constant 0 : i32
    %2 = arith.cmpi ne, %1, %c0_i32_0 : i32
    scf.if %2 {
      %cst_20 = arith.constant 0xFF800000 : f32
      %29 = vector.broadcast %cst_20 : f32 to vector<16x1xf32>
      %c0_21 = arith.constant 0 : index
      %c0_22 = arith.constant 0 : index
      %30 = vector.load %arg7[%c0_21, %c0_22] : memref<16x1xf32, #tpu.memory_space<vmem>>, vector<16x1xf32>
      tpu.vector_store %arg7[%c0_21, %c0_22], %29 {strides = array<i32>} : memref<16x1xf32, #tpu.memory_space<vmem>>, vector<16x1xf32>,
      %cst_23 = arith.constant 0.000000e+00 : f32
      %31 = vector.broadcast %cst_23 : f32 to vector<16x1xf32>
      %c0_24 = arith.constant 0 : index
      %c0_25 = arith.constant 0 : index
      %32 = vector.load %arg8[%c0_24, %c0_25] : memref<16x1xf32, #tpu.memory_space<vmem>>, vector<16x1xf32>
      tpu.vector_store %arg8[%c0_24, %c0_25], %31 {strides = array<i32>} : memref<16x1xf32, #tpu.memory_space<vmem>>, vector<16x1xf32>,
    } else {
    }
    %c0 = arith.constant 0 : index
    %c0_1 = arith.constant 0 : index
    %3 = vector.load %arg2[%c0, %c0_1] : memref<16x32xbf16, #tpu.memory_space<vmem>>, vector<16x32xbf16>
    %c0_2 = arith.constant 0 : index
    %c0_3 = arith.constant 0 : index
    %4 = vector.load %arg3[%c0_2, %c0_3] : memref<128x32xbf16, #tpu.memory_space<vmem>>, vector<128x32xbf16>
    %cst = arith.constant dense<0.000000e+00> : vector<16x128xf32>
    %5 = tpu.matmul %3, %4, %cst {dimension_numbers = #tpu.dot_dimension_numbers<[1], [1], [0], [0], [0, 0, 1, 0], [], []>} : vector<16x32xbf16>, vector<128x32xbf16>, vector<16x128xf32> -> vector<16x128xf32>
    %c0_4 = arith.constant 0 : index
    %c0_5 = arith.constant 0 : index
    %6 = vector.load %arg4[%c0_4, %c0_5] : memref<1x128xf32, #tpu.memory_space<vmem>>, vector<1x128xf32>
    %7 = vector.broadcast %6 : vector<1x128xf32> to vector<16x128xf32>
    %8 = arith.addf %5, %7 : vector<16x128xf32>
    %c0_6 = arith.constant 0 : index
    %c0_7 = arith.constant 0 : index
    %9 = vector.load %arg5[%c0_6, %c0_7] : memref<16x128xf32, #tpu.memory_space<vmem>>, vector<16x128xf32>
    tpu.vector_store %arg5[%c0_6, %c0_7], %8 {strides = array<i32>} : memref<16x128xf32, #tpu.memory_space<vmem>>, vector<16x128xf32>,
    %c0_8 = arith.constant 0 : index
    %c0_9 = arith.constant 0 : index
    %10 = vector.load %arg7[%c0_8, %c0_9] : memref<16x1xf32, #tpu.memory_space<vmem>>, vector<16x1xf32>
    %cst_10 = arith.constant dense<0xFF800000> : vector<16xf32>
    %11 = vector.multi_reduction <maximumf>, %8, %cst_10 [1] : vector<16x128xf32> to vector<16xf32>
    %12 = vector.shape_cast %11 : vector<16xf32> to vector<16x1xf32>
    %13 = arith.maximumf %10, %12 : vector<16x1xf32>
    %14 = arith.subf %10, %13 : vector<16x1xf32>
    %15 = math.exp %14 : vector<16x1xf32>
    %c0_11 = arith.constant 0 : index
    %c0_12 = arith.constant 0 : index
    %16 = vector.load %arg8[%c0_11, %c0_12] : memref<16x1xf32, #tpu.memory_space<vmem>>, vector<16x1xf32>
    %17 = arith.mulf %15, %16 : vector<16x1xf32>
    %18 = vector.broadcast %13 : vector<16x1xf32> to vector<16x128xf32>
    %19 = arith.subf %8, %18 : vector<16x128xf32>
    %20 = math.exp %19 : vector<16x128xf32>
    %cst_13 = arith.constant dense<0.000000e+00> : vector<16xf32>
    %21 = vector.multi_reduction <add>, %20, %cst_13 [1] : vector<16x128xf32> to vector<16xf32>
    %22 = vector.shape_cast %21 : vector<16xf32> to vector<16x1xf32>
    %23 = arith.addf %17, %22 : vector<16x1xf32>
    %c0_14 = arith.constant 0 : index
    %c0_15 = arith.constant 0 : index
    %24 = vector.load %arg8[%c0_14, %c0_15] : memref<16x1xf32, #tpu.memory_space<vmem>>, vector<16x1xf32>
    tpu.vector_store %arg8[%c0_14, %c0_15], %23 {strides = array<i32>} : memref<16x1xf32, #tpu.memory_space<vmem>>, vector<16x1xf32>,
    %c0_16 = arith.constant 0 : index
    %c0_17 = arith.constant 0 : index
    %25 = vector.load %arg7[%c0_16, %c0_17] : memref<16x1xf32, #tpu.memory_space<vmem>>, vector<16x1xf32>
    tpu.vector_store %arg7[%c0_16, %c0_17], %13 {strides = array<i32>} : memref<16x1xf32, #tpu.memory_space<vmem>>, vector<16x1xf32>,
    %c0_i32_18 = arith.constant 0 : i32
    %26 = arith.cmpi eq, %arg1, %c0_i32_18 : i32
    %27 = arith.extui %26 : i1 to i32
    %c0_i32_19 = arith.constant 0 : i32
    %28 = arith.cmpi ne, %27, %c0_i32_19 : i32
    scf.if %28 {
      %c0_20 = arith.constant 0 : index
      %c0_21 = arith.constant 0 : index
      %29 = vector.load %arg7[%c0_20, %c0_21] : memref<16x1xf32, #tpu.memory_space<vmem>>, vector<16x1xf32>
      %c0_22 = arith.constant 0 : index
      %c0_23 = arith.constant 0 : index
      %30 = vector.load %arg8[%c0_22, %c0_23] : memref<16x1xf32, #tpu.memory_space<vmem>>, vector<16x1xf32>
      %31 = math.log %30 : vector<16x1xf32>
      %32 = arith.addf %29, %31 : vector<16x1xf32>
      %c0_24 = arith.constant 0 : index
      %c0_25 = arith.constant 0 : index
      %33 = vector.load %arg6[%c0_24, %c0_25] : memref<16x1xf32, #tpu.memory_space<vmem>>, vector<16x1xf32>
      tpu.vector_store %arg6[%c0_24, %c0_25], %32 {strides = array<i32>} : memref<16x1xf32, #tpu.memory_space<vmem>>, vector<16x1xf32>,
    } else {
    }
    return
  }
  func.func @transform_0(%arg0: i32, %arg1: i32) -> (i32, i32) {
    %c0_i32 = arith.constant 0 : i32
    %c0_i32_0 = arith.constant 0 : i32
    return %arg0, %c0_i32 : i32, i32
  }
  func.func @transform_1(%arg0: i32, %arg1: i32) -> (i32, i32) {
    %c0_i32 = arith.constant 0 : i32
    %c0_i32_0 = arith.constant 0 : i32
    return %arg1, %c0_i32 : i32, i32
  }
  func.func @transform_2(%arg0: i32, %arg1: i32) -> (i32, i32) {
    %c0_i32 = arith.constant 0 : i32
    %c0_i32_0 = arith.constant 0 : i32
    return %c0_i32, %arg1 : i32, i32
  }
  func.func @transform_3(%arg0: i32, %arg1: i32) -> (i32, i32) {
    %c0_i32 = arith.constant 0 : i32
    return %arg0, %arg1 : i32, i32
  }
  func.func @transform_4(%arg0: i32, %arg1: i32) -> (i32, i32) {
    %c0_i32 = arith.constant 0 : i32
    %c0_i32_0 = arith.constant 0 : i32
    return %arg0, %c0_i32 : i32, i32
  }
}

</mosaic_0001>

<bundles_post_ra>
// kernel: _forward_impl.3
= control target key start
LH: loop header
LB: loop body
LE: loop exit
PB: predicated region body
PF: predicated region fallthrough
CT: control target
= control target key end

     0   :  { %v35_v0 = vmov 0   ;;  %s69_s1 = inlined_call_operand.vmem [shape: f32[16,1], index: 1, kind: input, shape index: {}]   ;;  %s70_s0 = inlined_call_operand.vmem [shape: f32[16,128], index: 0, kind: input, shape index: {}, may-alias: {0,2}]   ;;  %s71_s2 = inlined_call_operand.vmem [shape: f32[16,128], index: 2, kind: output, shape index: {}, may-alias: {0,2}]  }
   0x1   :  { %34 = vset.pattern.permute.xlu0 %v35_v0  ;;  %v13_v1 = vld [vmem:[%s69_s1] sm:$0xff]  ;;  %v14_v2 = vld [vmem:[%s69_s1 + $0x8] sm:$0xff] }
   0x2   :  { %17 = vperm.xlu0 %34, %v13_v1   ;;  %v11_v3 = vld [vmem:[%s70_s0] sm:$0xff]  ;;  %v12_v6 = vld [vmem:[%s70_s0 + $0x8] sm:$0xff] }
   0x6   :  { %22 = vperm.xlu0 %34, %v14_v2  }
  0x7d   :  { %v18_v4 = vpop.permute.xlu0 %17 }
  0x7e   :  { %v25_v5 = vsub.f32 %v11_v3, %v18_v4 }
  0x80   :  { %27 = vst [vmem:[%s71_s2] sm:$0xff] %v25_v5 }
  0x81   :  { %v23_v7 = vpop.permute.xlu0 %22 }
  0x82   :  { %v26_v8 = vsub.f32 %v12_v6, %v23_v7 }
  0x84   :  { %28 = vst [vmem:[%s71_s2 + $0x8] sm:$0xff] %v26_v8 }

// kernel: _forward_impl.2
= control target key start
LH: loop header
LB: loop body
LE: loop exit
PB: predicated region body
PF: predicated region fallthrough
CT: control target
= control target key end

     0   :  { %vm96_vm0 = vcmask 261120   ;;  %v302_v0 = vmov 0.0   ;;  %vm303_vm1 = vmmov 0   ;;  %vm21_vm2 = vcmask 7168   ;;  %s392_s1 = inlined_call_operand.vmem [shape: bf16[128,32], index: 1, kind: input, shape index: {}]   ;;  %s393_s0 = inlined_call_operand.vmem [shape: bf16[16,32], index: 0, kind: input, shape index: {}]   ;;  %s394_s2 = inlined_call_operand.vmem [shape: f32[1,128], index: 2, kind: input, shape index: {}]   ;;  %s395_s3 = inlined_call_operand.vmem [shape: f32[16,128], index: 3, kind: output, shape index: {0}]   ;;  %s396_s4 = inlined_call_operand.vmem [shape: f32[16,1], index: 4, kind: output, shape index: {1}]  }
   0x1   :  { %255 = vmatprep.subr.bf16.mxu0 %v302_v0  ;;  %v281_v1 = vld [vmem:[%s392_s1 + $0x38] sm:$0xff]   ;;  %271 = vmatprep.mubr.msk.bf16.mxu0 %vm303_vm1, %v302_v0  ;;  %v282_v3 = vld [vmem:[%s392_s1 + $0x30] sm:$0xff]   ;;  %v283_v5 = vld [vmem:[%s392_s1 + $0x28] sm:$0xff]   ;;  %v304_v18 = vmov -inf   ;;  %24 = vst.msk [vmem:[#allocation3] sm:$0xff] %vm21_vm2, %v302_v0  ;;  %v305_v26 = vmov 0  }
   0x2   :  { %v122_v2 = vsel %vm96_vm0, %v281_v1, 0  ;;  %v119_v4 = vsel %vm96_vm0, %v282_v3, 0  ;;  %v116_v6 = vsel %vm96_vm0, %v283_v5, 0  ;;  %v284_v7 = vld [vmem:[%s392_s1 + $0x20] sm:$0xff]   ;;  %v285_v9 = vld [vmem:[%s392_s1 + $0x18] sm:$0xff]   ;;  %v286_v11 = vld [vmem:[%s392_s1 + $0x10] sm:$0xff]   ;;  %279 = vset.pattern.permute.xlu1 %v305_v26  ;;  %280 = vset.pattern.permute.xlu0 %v305_v26 }
   0x3   :  { %256 = vmatpush3.bf16.xpose.msra.mxu0 %v122_v2  ;;  %v113_v8 = vsel %vm96_vm0, %v284_v7, 0  ;;  %v110_v10 = vsel %vm96_vm0, %v285_v9, 0  ;;  %v107_v12 = vsel %vm96_vm0, %v286_v11, 0  ;;  %v287_v13 = vld [vmem:[%s392_s1 + $0x8] sm:$0xff]   ;;  %v288_v15 = vld [vmem:[%s392_s1] sm:$0xff]   ;;  %22 = vst.msk [vmem:[#allocation2] sm:$0xff] %vm21_vm2, %v304_v18 }
   0x4   :  { %257 = vmatprep.subr.bf16.mxu0 %v302_v0  ;;  %v104_v14 = vsel %vm96_vm0, %v287_v13, 0  ;;  %v101_v16 = vsel %vm96_vm0, %v288_v15, 0  ;;  %v289_v17 = vld [vmem:[%s393_s0] sm:$0xff]   ;;  %23 = vst.msk [vmem:[#allocation2 + $0x8] sm:$0xff] %vm21_vm2, %v304_v18  ;;  %25 = vst.msk [vmem:[#allocation3 + $0x8] sm:$0xff] %vm21_vm2, %v302_v0 }
   0x5   :  { %v235_v19 = vld [vmem:[%s394_s2] ss:$0 sm:$0xff] }
   0x8   :  { %v181_v46 = vld [vmem:[#allocation3] sm:$0xff] }
   0xa   :  { %v167_v27 = vld [vmem:[#allocation2] sm:$0xff] }
   0xb   :  { %258 = vmatpush3.bf16.xpose.msra.mxu0 %v119_v4  ;;  %v168_v30 = vld [vmem:[#allocation2 + $0x8] sm:$0xff]  ;;  %v182_v50 = vld [vmem:[#allocation3 + $0x8] sm:$0xff] }
   0xc   :  { %259 = vmatprep.subr.bf16.mxu0 %v302_v0 }
  0x13   :  { %260 = vmatpush3.bf16.xpose.msra.mxu0 %v116_v6 }
  0x14   :  { %261 = vmatprep.subr.bf16.mxu0 %v302_v0 }
  0x1b   :  { %262 = vmatpush3.bf16.xpose.msra.mxu0 %v113_v8 }
  0x1c   :  { %263 = vmatprep.subr.bf16.mxu0 %v302_v0 }
  0x23   :  { %264 = vmatpush3.bf16.xpose.msra.mxu0 %v110_v10 }
  0x24   :  { %265 = vmatprep.subr.bf16.mxu0 %v302_v0 }
  0x2b   :  { %266 = vmatpush3.bf16.xpose.msra.mxu0 %v107_v12 }
  0x2c   :  { %267 = vmatprep.subr.bf16.mxu0 %v302_v0 }
  0x33   :  { %268 = vmatpush3.bf16.xpose.msra.mxu0 %v104_v14 }
  0x34   :  { %269 = vmatprep.subr.bf16.mxu0 %v302_v0 }
  0x3b   :  { %270 = vmatpush3.bf16.xpose.msra.mxu0 %v101_v16 }
  0x42   :  { %272 = vmatmul.mubr.msk.bf16.vlgmr.msra.gmra.mxu0 %vm96_vm0, %v289_v17 }
 0x102   :  { %v158_v20 = vpop.f32.mrf.mxu0 }
 0x103   :  { %v159_v21 = vadd.f32 %v235_v19, %v158_v20 }
 0x104   :  { %v273_v22 = vpop.f32.mrf.mxu0 }
 0x105   :  { %165 = vst [vmem:[%s395_s3] sm:$0xff] %v159_v21  ;;  %169 = vmax.xlane.f32.xlu0 %v159_v21 }
 0x106   :  { %v161_v23 = vpop.f32.mrf.mxu0 }
 0x107   :  { %v162_v24 = vadd.f32 %v235_v19, %v161_v23 }
 0x108   :  { %v274_v25 = vpop.f32.mrf.mxu0 }
 0x109   :  { %166 = vst [vmem:[%s395_s3 + $0x8] sm:$0xff] %v162_v24  ;;  %171 = vmax.xlane.f32.xlu0 %v162_v24 }
 0x18e   :  { %v170_v28 = vpop.xlane.xlu0 %169 }
 0x18f   :  { %v173_v29 = vmax.f32 %v167_v27, %v170_v28 }
 0x191   :  { %v175_v31 = vsub.f32 %v167_v27, %v173_v29  ;;  %210 = vst.msk [vmem:[#allocation2] sm:$0xff] %vm21_vm2, %v173_v29  ;;  %187 = vperm.xlu1 %279, %v173_v29  }
 0x192   :  { %v172_v32 = vpop.xlane.xlu0 %171 }
 0x193   :  { %v174_v33 = vmax.f32 %v168_v30, %v172_v32  ;;  %v177_v43 = vmul.f32 1.442695, %v175_v31 }
 0x195   :  { %v176_v34 = vsub.f32 %v168_v30, %v174_v33  ;;  %211 = vst.msk [vmem:[#allocation2 + $0x8] sm:$0xff] %vm21_vm2, %v174_v33  ;;  %192 = vperm.xlu1 %279, %v174_v33  }
 0x197   :  { %v179_v44 = vmul.f32 1.442695, %v176_v34 }
 0x198   :  { %v215_v59 = vld [vmem:[#allocation2] sm:$0xff] }
 0x19c   :  { %v216_v63 = vld [vmem:[#allocation2 + $0x8] sm:$0xff] }
 0x20c   :  { %v188_v35 = vpop.permute.xlu1 %187 }
 0x20d   :  { %v195_v36 = vsub.f32 %v159_v21, %v188_v35 }
 0x20f   :  { %v197_v37 = vmul.f32 1.442695, %v195_v36 }
 0x210   :  { %v193_v38 = vpop.permute.xlu1 %192 }
 0x211   :  { %290 = vpow2.f32 %v197_v37  ;;  %v196_v39 = vsub.f32 %v162_v24, %v193_v38 }
 0x213   :  { %v199_v40 = vmul.f32 1.442695, %v196_v39 }
 0x215   :  { %292 = vpow2.f32 %v199_v40 }
 0x216   :  { %294 = vpow2.f32 %v177_v43 }
 0x217   :  { %296 = vpow2.f32 %v179_v44 }
 0x21e   :  { %v291_v41 = vpop.eup %290 }
 0x21f   :  { %201 = vadd.xlane.f32.xlu0 %v291_v41 }
 0x222   :  { %v293_v42 = vpop.eup %292 }
 0x223   :  { %203 = vadd.xlane.f32.xlu1 %v293_v42  ;;  %v295_v45 = vpop.eup %294 }
 0x224   :  { %v183_v47 = vmul.f32 %v295_v45, %v181_v46  ;;  %v297_v48 = vpop.eup %296 }
 0x225   :  { %v184_v52 = vmul.f32 %v297_v48, %v182_v50 }
 0x2a8   :  { %v202_v49 = vpop.xlane.xlu0 %201 }
 0x2a9   :  { %v205_v51 = vadd.f32 %v202_v49, %v183_v47 }
 0x2ab   :  { %208 = vst.msk [vmem:[#allocation3] sm:$0xff] %vm21_vm2, %v205_v51 }
 0x2ac   :  { %v204_v53 = vpop.xlane.xlu1 %203 }
 0x2ad   :  { %v206_v54 = vadd.f32 %v204_v53, %v184_v52 }
 0x2af   :  { %209 = vst.msk [vmem:[#allocation3 + $0x8] sm:$0xff] %vm21_vm2, %v206_v54 }
 0x2b2   :  { %v217_v55 = vld [vmem:[#allocation3] sm:$0xff] }
 0x2b3   :  { %298 = vlog2.f32 %v217_v55 }
 0x2b6   :  { %v218_v56 = vld [vmem:[#allocation3 + $0x8] sm:$0xff] }
 0x2b7   :  { %300 = vlog2.f32 %v218_v56 }
 0x2c0   :  { %v299_v57 = vpop.eup %298 }
 0x2c1   :  { %v220_v58 = vmul.f32 0.6931472, %v299_v57 }
 0x2c3   :  { %v223_v60 = vadd.f32 %v220_v58, %v215_v59 }
 0x2c4   :  { %v301_v61 = vpop.eup %300 }
 0x2c5   :  { %225 = vst.msk [vmem:[%s396_s4] sm:$0xff] %vm21_vm2, %v223_v60  ;;  %v222_v62 = vmul.f32 0.6931472, %v301_v61 }
 0x2c7   :  { %v224_v0 = vadd.f32 %v222_v62, %v216_v63 }
 0x2c9   :  { %226 = vst.msk [vmem:[%s396_s4 + $0x8] sm:$0xff] %vm21_vm2, %v224_v0 }

</bundles_post_ra>
